<compile_context>
chip_gen: v7x
topology: tpu7x:2x2x1
jax: 0.10.0
libtpu: 0.0.40
codegen_flags: <defaults>
</compile_context>

<pallas_src>
import jax
import jax.numpy as jnp
from jax.experimental import pallas as pl
from jax.experimental.pallas import tpu as pltpu

_LANES = 128  # lane width of the per-shard partial-sum output block


# ---------------------------------------------------------------------------
# Kernel
# ---------------------------------------------------------------------------
def _entropy_block_sum(x, lp, row0, n_valid):
    """sum over valid rows of  -sum_c softmax(x) * (log_softmax(x) - lp)
       = sum_rows [ log(s) - (1/s) * sum_c e*(z - lp) ],
       z = x - max, e = exp(z), s = sum_c e   (no softmax/log_softmax temps)."""
    m = jnp.max(x, axis=1, keepdims=True)          # (T, 1)
    z = x - m                                      # (T, C)
    e = jnp.exp(z)                                 # (T, C)  (EUP)
    s = jnp.sum(e, axis=1, keepdims=True)          # (T, 1)  (XLU)
    zl = z if lp is None else z - lp
    t = jnp.sum(e * zl, axis=1, keepdims=True)     # (T, 1)  (XLU)
    # approx=False keeps the 1e-5 test tolerance.
    per_row = jnp.log(s) - t * pl.reciprocal(s, approx=False)   # (T, 1)
    # Rows past the true batch size (ragged last block / clamped duplicate
    # blocks) may contain garbage (possibly NaN/Inf): select-mask over the
    # tiny (T, 1) vector — never a multiplicative 0/1 mask (0*Inf = NaN).
    row_ids = row0 + jax.lax.broadcasted_iota(jnp.int32, per_row.shape, 0)
    per_row = jnp.where(row_ids < n_valid, per_row, 0.0)
    return jnp.sum(per_row)


def _make_kernel(has_prior, num_shards, tile_n, tiles_per_shard):
    def kernel(*refs):
        if has_prior:
            n_ref, x_ref, lp_ref, out_ref = refs
            lp = lp_ref[...].astype(jnp.float32)   # (1, C) shared or (tile_n, C) per-row
        else:
            n_ref, x_ref, out_ref = refs
            lp = None

        if num_shards > 1:
            shard, step = pl.program_id(0), pl.program_id(1)
        else:
            shard, step = 0, pl.program_id(0)

        @pl.when(step == 0)
        def _():
            out_ref[...] = jnp.zeros_like(out_ref)

        block = shard * tiles_per_shard + step       # un-clamped global block index
        x = x_ref[...].astype(jnp.float32)
        out_ref[...] += _entropy_block_sum(x, lp, block * tile_n, n_ref[0])

    return kernel


# ---------------------------------------------------------------------------
# Sizing / device introspection
# ---------------------------------------------------------------------------
def _vmem_capacity_bytes():
    try:
        return int(pltpu.get_tpu_info().vmem_capacity_bytes)
    except Exception:
        return 64 << 20   # conservative (v7x-sized)


def _num_shards():
    """2 only on v7x-class devices (2 TensorCores per chip); 1 TC otherwise."""
    try:
        kind = jax.devices()[0].device_kind.lower()
    except Exception:
        return 1
    if "v7" in kind and hasattr(pltpu, "CORE_PARALLEL"):
        return 2
    return 1


def _pick_tile(n, c, in_itemsize, per_row_prior):
    """Row-tile size from the *VMEM* working set (lane-padded C, f32 temps,
    double-buffered input), not HBM bytes.  Returns (tile_n, vmem_limit)."""
    c_pad = ((c + _LANES - 1) // _LANES) * _LANES
    in_row = c_pad * max(int(in_itemsize), 2)   # input rows as laid out in VMEM
    f32_row = c_pad * 4
    per_row = 2 * in_row + 4 * f32_row          # 2x double-buffered input + ~4 f32 temps
    if per_row_prior:
        per_row += 2 * f32_row                  # double-buffered f32 per-row prior

    cap = _vmem_capacity_bytes()
    # v7x: 64 MiB/TC -> plan ~40 MiB.  v5e/v6e: 128 MiB -> ~64 MiB is plenty
    # (mem-bound kernels saturate HBM well before that; per-step overhead <1%).
    budget = (40 << 20) if cap <= (64 << 20) else (64 << 20)

    rows = max(8, (budget // per_row) // 8 * 8)
    tile_n = int(min(rows, n))                  # full-extent block allowed if n is small

    working = tile_n * per_row + (4 << 20)      # + output block / shared prior / slack
    vmem_limit = int(min(cap - (8 << 20), max(24 << 20, working)))
    return tile_n, vmem_limit


# ---------------------------------------------------------------------------
# Wrapper
# ---------------------------------------------------------------------------
def hloss(x, prior=None, *, tile_rows=None):
    """Pallas equivalent of HLoss.forward:
       mean over rows of  -sum_c softmax(x) * (log_softmax(x) - log(prior))."""
    x = jnp.asarray(x)
    if not jnp.issubdtype(x.dtype, jnp.floating):
        x = x.astype(jnp.float32)
    n, c = x.shape

    has_prior = prior is not None
    lp_arr = None
    per_row_prior = False
    if has_prior:
        lp_arr = jnp.log(jnp.asarray(prior, jnp.float32)).reshape(-1, c)
        per_row_prior = lp_arr.shape[0] != 1

    tile_n, vmem_limit = _pick_tile(n, c, x.dtype.itemsize, per_row_prior)
    if tile_rows is not None:                   # test hook: force small tiles
        tile_n = int(min(tile_rows, n))
        if tile_n < n:
            tile_n = max(8, (tile_n // 8) * 8)

    tiles_total = pl.cdiv(n, tile_n)

    num_shards = _num_shards()
    if tiles_total < 2:
        num_shards = 1

    if num_shards > 1:
        tiles_per_shard = pl.cdiv(tiles_total, num_shards)
        grid = (num_shards, tiles_per_shard)
        max_block = tiles_total - 1

        # Clamp so a ragged shard never indexes past the array; the duplicate
        # block re-read is fully masked in-kernel (row0 uses the un-clamped id).
        def x_map(s, i, n_ref):
            return (jnp.minimum(s * tiles_per_shard + i, max_block), 0)

        out_map = lambda s, i, n_ref: (s, 0)
        lp_shared_map = lambda s, i, n_ref: (0, 0)
        semantics = (pltpu.CORE_PARALLEL, pltpu.ARBITRARY)
    else:
        tiles_per_shard = tiles_total
        grid = (tiles_total,)
        x_map = lambda i, n_ref: (i, 0)
        out_map = lambda i, n_ref: (0, 0)
        lp_shared_map = lambda i, n_ref: (0, 0)
        semantics = (pltpu.ARBITRARY,)

    in_specs = [pl.BlockSpec((tile_n, c), x_map)]
    args = [x]
    if has_prior:
        if per_row_prior:
            in_specs.append(pl.BlockSpec((tile_n, c), x_map))   # tiled like x (no padding)
        else:
            in_specs.append(pl.BlockSpec((1, c), lp_shared_map))  # (1, C) stays VMEM-resident
        args.append(lp_arr)

    out_spec = pl.BlockSpec((8, _LANES), out_map)
    out_shape = jax.ShapeDtypeStruct((num_shards * 8, _LANES), jnp.float32)

    kernel = _make_kernel(has_prior, num_shards, tile_n, tiles_per_shard)

    grid_spec = pltpu.PrefetchScalarGridSpec(
        num_scalar_prefetch=1,        # n (true batch size) lives in SMEM
        grid=grid,
        in_specs=in_specs,
        out_specs=out_spec,
    )

    partials = pl.pallas_call(
        kernel,
        out_shape=out_shape,
        grid_spec=grid_spec,
        compiler_params=pltpu.CompilerParams(
            dimension_semantics=semantics,
            vmem_limit_bytes=vmem_limit,
        ),
    )(jnp.array([n], jnp.int32), *args)

    # One partial per shard at row 8*s (every element of that block carries it).
    total = jnp.sum(partials[::8, 0])
    return total / jnp.float32(n)


# ---------------------------------------------------------------------------
# Pure-JAX reference of the PyTorch forward, for verification.
# ---------------------------------------------------------------------------
def _hloss_ref(x, prior=None):
    x = jnp.asarray(x, jnp.float32)
    logp = jax.nn.log_softmax(x, axis=1)
    p = jax.nn.softmax(x, axis=1)
    if prior is None:
        b = p * logp
    else:
        lp = jnp.log(jnp.asarray(prior, jnp.float32)).reshape(-1, x.shape[1])
        b = p * (logp - lp)
    return jnp.mean(-jnp.sum(b, axis=1))


if __name__ == "__main__":
    key = jax.random.PRNGKey(0)
    kx, kp, kx2, kp2, kx3 = jax.random.split(key, 5)

    # Branch 1: no prior (pure entropy), small aligned batch.
    N, C = 8, 32
    x = jax.random.normal(kx, (N, C), dtype=jnp.float32)
    out1 = hloss(x)
    jax.block_until_ready(out1)
    ref1 = _hloss_ref(x)
    assert jnp.allclose(out1, ref1, atol=1e-5, rtol=1e-5), (out1, ref1)

    # Branch 2: shared class prior (positive, normalized).
    prior = jax.nn.softmax(jax.random.normal(kp, (C,), dtype=jnp.float32))
    out2 = hloss(x, prior)
    jax.block_until_ready(out2)
    ref2 = _hloss_ref(x, prior)
    assert jnp.allclose(out2, ref2, atol=1e-5, rtol=1e-5), (out2, ref2)

    # Branch 3: ragged batch + per-row prior, forced small tiles so the
    # unpadded ragged-last-block masking path is exercised (no jnp.pad of x).
    N2, C2 = 50, 160
    x2 = jax.random.normal(kx2, (N2, C2), dtype=jnp.float32)
    prior2 = jax.nn.softmax(jax.random.normal(kp2, (N2, C2), dtype=jnp.float32), axis=1)
    out3 = hloss(x2, prior2, tile_rows=16)
    jax.block_until_ready(out3)
    ref3 = _hloss_ref(x2, prior2)
    assert jnp.allclose(out3, ref3, atol=1e-5, rtol=1e-5), (out3, ref3)

    # Branch 4: bf16 input stays bf16 in HBM; arithmetic is f32 in-kernel.
    x3 = jax.random.normal(kx3, (24, 256), dtype=jnp.float32).astype(jnp.bfloat16)
    out4 = hloss(x3)
    jax.block_until_ready(out4)
    ref4 = _hloss_ref(x3.astype(jnp.float32))
    assert jnp.allclose(out4, ref4, atol=1e-4, rtol=1e-4), (out4, ref4)

    print("KERNEL_OK")
</pallas_src>

<mosaic_0001>
module attributes {stable_mosaic.version = 11 : i64} {
  func.func @kernel(%arg0: i32, %arg1: memref<1xi32, #tpu.memory_space<smem>>, %arg2: memref<8x32xf32, #tpu.memory_space<vmem>>, %arg3: memref<8x128xf32, #tpu.memory_space<vmem>>) attributes {dimension_semantics = [#tpu.dimension_semantics<arbitrary>], iteration_bounds = array<i64: 1>, scalar_prefetch = 1 : i64, scratch_operands = 0 : i64, tpu.core_type = #tpu.core_type<tc>, window_params = [{transform_indices = @transform_0, window_bounds = array<i64: 8, 32>}, {pipeline_mode = #tpu.pipeline_mode<synchronous>, transform_indices = @transform_1, window_bounds = array<i64: 8, 128>}]} {
    %c0_i32 = arith.constant 0 : i32
    %0 = arith.cmpi eq, %arg0, %c0_i32 : i32
    %1 = arith.extui %0 : i1 to i32
    %c0_i32_0 = arith.constant 0 : i32
    %2 = arith.cmpi ne, %1, %c0_i32_0 : i32
    scf.if %2 {
      %cst_12 = arith.constant 0.000000e+00 : f32
      %36 = vector.broadcast %cst_12 : f32 to vector<8x128xf32>
      %c0_13 = arith.constant 0 : index
      %c0_14 = arith.constant 0 : index
      %37 = vector.load %arg3[%c0_13, %c0_14] : memref<8x128xf32, #tpu.memory_space<vmem>>, vector<8x128xf32>
      tpu.vector_store %arg3[%c0_13, %c0_14], %36 {strides = array<i32>} : memref<8x128xf32, #tpu.memory_space<vmem>>, vector<8x128xf32>,
    } else {
    }
    %c0_i32_1 = arith.constant 0 : i32
    %3 = arith.addi %c0_i32_1, %arg0 : i32
    %c0 = arith.constant 0 : index
    %c0_2 = arith.constant 0 : index
    %4 = vector.load %arg2[%c0, %c0_2] : memref<8x32xf32, #tpu.memory_space<vmem>>, vector<8x32xf32>
    %c0_3 = arith.constant 0 : index
    %c0_4 = arith.constant 0 : index
    %5 = vector.load %arg3[%c0_3, %c0_4] : memref<8x128xf32, #tpu.memory_space<vmem>>, vector<8x128xf32>
    %c8_i32 = arith.constant 8 : i32
    %6 = arith.muli %3, %c8_i32 : i32
    %c0_5 = arith.constant 0 : index
    %7 = memref.load %arg1[%c0_5] : memref<1xi32, #tpu.memory_space<smem>>
    %cst = arith.constant dense<0xFF800000> : vector<8xf32>
    %8 = vector.multi_reduction <maximumf>, %4, %cst [1] : vector<8x32xf32> to vector<8xf32>
    %9 = vector.shape_cast %8 : vector<8xf32> to vector<8x1xf32>
    %10 = vector.broadcast %9 : vector<8x1xf32> to vector<8x32xf32>
    %11 = arith.subf %4, %10 : vector<8x32xf32>
    %12 = math.exp %11 : vector<8x32xf32>
    %cst_6 = arith.constant dense<0.000000e+00> : vector<8xf32>
    %13 = vector.multi_reduction <add>, %12, %cst_6 [1] : vector<8x32xf32> to vector<8xf32>
    %14 = vector.shape_cast %13 : vector<8xf32> to vector<8x1xf32>
    %15 = arith.mulf %12, %11 : vector<8x32xf32>
    %cst_7 = arith.constant dense<0.000000e+00> : vector<8xf32>
    %16 = vector.multi_reduction <add>, %15, %cst_7 [1] : vector<8x32xf32> to vector<8xf32>
    %17 = vector.shape_cast %16 : vector<8xf32> to vector<8x1xf32>
    %18 = math.log %14 : vector<8x1xf32>
    %19 = tpu.reciprocal %14 : vector<8x1xf32> -> vector<8x1xf32>
    %20 = arith.mulf %17, %19 : vector<8x1xf32>
    %21 = arith.subf %18, %20 : vector<8x1xf32>
    %22 = tpu.iota {dimensions = array<i32: 0>} : vector<8x1xi32>
    %23 = vector.broadcast %6 : i32 to vector<8x1xi32>
    %24 = arith.addi %23, %22 : vector<8x1xi32>
    %25 = vector.broadcast %7 : i32 to vector<8x1xi32>
    %26 = arith.cmpi slt, %24, %25 : vector<8x1xi32>
    %cst_8 = arith.constant 0.000000e+00 : f32
    %27 = vector.broadcast %cst_8 : f32 to vector<8x1xf32>
    %28 = arith.select %26, %21, %27 : vector<8x1xi1>, vector<8x1xf32>
    %29 = vector.shape_cast %28 : vector<8x1xf32> to vector<1x8x1xf32>
    %cst_9 = arith.constant dense<0.000000e+00> : vector<1xf32>
    %30 = vector.multi_reduction <add>, %29, %cst_9 [1, 2] : vector<1x8x1xf32> to vector<1xf32>
    %31 = vector.shape_cast %30 : vector<1xf32> to vector<1x1x1xf32>
    %32 = vector.extract %31[0, 0, 0] : f32 from vector<1x1x1xf32>
    %33 = vector.broadcast %32 : f32 to vector<8x128xf32>
    %34 = arith.addf %5, %33 : vector<8x128xf32>
    %c0_10 = arith.constant 0 : index
    %c0_11 = arith.constant 0 : index
    %35 = vector.load %arg3[%c0_10, %c0_11] : memref<8x128xf32, #tpu.memory_space<vmem>>, vector<8x128xf32>
    tpu.vector_store %arg3[%c0_10, %c0_11], %34 {strides = array<i32>} : memref<8x128xf32, #tpu.memory_space<vmem>>, vector<8x128xf32>,
    return
  }
  func.func @transform_0(%arg0: i32, %arg1: memref<1xi32, #tpu.memory_space<smem>>) -> (i32, i32) {
    %c0_i32 = arith.constant 0 : i32
    %c0_i32_0 = arith.constant 0 : i32
    return %arg0, %c0_i32 : i32, i32
  }
  func.func @transform_1(%arg0: i32, %arg1: memref<1xi32, #tpu.memory_space<smem>>) -> (i32, i32) {
    %c0_i32 = arith.constant 0 : i32
    %c0_i32_0 = arith.constant 0 : i32
    %c0_i32_1 = arith.constant 0 : i32
    return %c0_i32, %c0_i32_0 : i32, i32
  }
}

</mosaic_0001>

<bundles_post_ra>
// kernel: tpu_custom_call.1
= control target key start
LH: loop header
LB: loop body
LE: loop exit
PB: predicated region body
PF: predicated region fallthrough
CT: control target
= control target key end

     0   :  { %8 = vsyncpa [#allocation5], 0  ;;  %s190_s0 = inlined_call_operand.<no memory space> [shape: s32[1], index: 0, kind: input, shape index: {}]   ;;  %s191_s1 = inlined_call_operand.hbm [shape: f32[8,32], index: 1, kind: input, shape index: {}]   ;;  %s192_s2 = inlined_call_operand.hbm [shape: f32[8,128], index: 2, kind: output, shape index: {}]  }
   0x1   :  { %9 = vsyncpa [#allocation6], 0  ;;  %s146_s9 = smov [#allocation4]   ;;  %s98_s13 = scalar_lea.hbm %s191_s1, 128 }
   0x2   :  { %s16_s10 = sshll.u32 %s146_s9, 4  ;;  %p99_p0 = scmp.ne.s32.totalorder %s191_s1, %s98_s13  ;;  %s17_s10 = int_to_ptr.vmem [resolvable:$true] %s16_s10 }
   0x3   :  { %p102_p1 = scmp.lt.u32.totalorder %s98_s13, %s191_s1 }
   0x5   :  { %p104_p2 = pnand %p102_p1, %p99_p0 }
   0x7   :  { %107 = shalt.err (!%p104_p2)
}
   0x8   :  { %s108_s18 = scalar_lea.vmem %s17_s10, 128  ;;  %p113_p4 = scmp.lt.s32.totalorder %s17_s10, %s17_s10 }
   0x9   :  { %p109_p3 = scmp.ne.s32.totalorder %s17_s10, %s108_s18  ;;  %p114_p5 = scmp.lt.s32.totalorder %s108_s18, %s108_s18 }
   0xb   :  { %p115_p6 = por %p114_p5, %p113_p4 }
   0xd   :  { %p116_p7 = pnand %p115_p6, %p109_p3 }
   0xf   :  { %119 = shalt.err (!%p116_p7)
}
  0x10   :  { %19 = dma.hbm_to_vmem [thread:$0]  %s191_s1, 128, %s17_s10, [#allocation5]  }
  0x11   :  { %142 = dma.done.wait [#allocation5], 128  }
  0x12   :  { %143 = vsyncadd [#allocation5], 4294967168  ;;  %vm32_vm0 = vcmask 261120   ;;  %v28_v0 = vld [vmem:[#allocation4] sm:$0xff]  ;;  %v51_v10 = vlaneseq  ;;  %v55_v13 = vstv %s190_s0  ;;  %vm58_vm2 = vcmask 7168   ;;  %s147_s22 = smov [#allocation7]  }
  0x13   :  { %v33_v1 = vsel %vm32_vm0, %v28_v0, -inf  ;;  %s78_s0 = sshll.u32 %s147_s22, 4  ;;  %s79_s0 = int_to_ptr.vmem [resolvable:$true] %s78_s0 }
  0x14   :  { %34 = vmax.xlane.f32.xlu0 %v33_v1  ;;  %v52_v11 = vshrl.u32 %v51_v10, 7  ;;  %s120_s24 = scalar_lea.vmem %s79_s0, 128  ;;  %p125_p9 = scmp.lt.s32.totalorder %s79_s0, %s79_s0 }
  0x15   :  { %p121_p8 = scmp.ne.s32.totalorder %s79_s0, %s120_s24  ;;  %p126_p10 = scmp.lt.s32.totalorder %s120_s24, %s120_s24 }
  0x16   :  { %vm56_vm1 = vcmp.lt.s32.totalorder %v52_v11, %v55_v13 }
  0x17   :  { %p127_p11 = por %p126_p10, %p125_p9 }
  0x19   :  { %p128_p12 = pnand %p127_p11, %p121_p8 }
  0xa1   :  { %v35_v2 = vpop.xlane.xlu0 %34 }
  0xa2   :  { %v36_v3 = vsub.f32 %v28_v0, %v35_v2 }
  0xa4   :  { %v37_v4 = vmul.f32 1.442695, %v36_v3 }
  0xa6   :  { %92 = vpow2.f32 %v37_v4 }
  0xb0   :  { %v93_v5 = vpop.eup %92 }
  0xb1   :  { %v39_v6 = vsel %vm32_vm0, %v93_v5, 0.0  ;;  %v42_v7 = vmul.f32 %v93_v5, %v36_v3 }
  0xb2   :  { %40 = vadd.xlane.f32.xlu0 %v39_v6 }
  0xb3   :  { %v43_v8 = vsel %vm32_vm0, %v42_v7, 0.0 }
  0xb4   :  { %44 = vadd.xlane.f32.xlu1 %v43_v8 }
 0x13f   :  { %v41_v9 = vpop.xlane.xlu0 %40 }
 0x140   :  { %94 = vlog2.f32 %v41_v9 }
 0x141   :  { %96 = vrcp.f32 %v41_v9  ;;  %v45_v16 = vpop.xlane.xlu1 %44 }
 0x14a   :  { %v95_v12 = vpop.eup %94 }
 0x14b   :  { %v97_v14 = vpop.eup %96  ;;  %v47_v15 = vmul.f32 0.6931472, %v95_v12 }
 0x14c   :  { %v49_v17 = vmul.f32 %v97_v14, %v45_v16 }
 0x14e   :  { %v50_v18 = vsub.f32 %v47_v15, %v49_v17 }
 0x150   :  { %v57_v19 = vsel %vm56_vm1, %v50_v18, 0.0 }
 0x151   :  { %v59_v20 = vsel %vm58_vm2, %v57_v19, 0.0 }
 0x152   :  { %60 = vadd.xlane.f32.xlu1 %v59_v20 }
 0x1df   :  { %v61_v21 = vpop.xlane.xlu1 %60 }
 0x1e0   :  { %v62_v22 = vrot.slane %v61_v21, 4 }
 0x1e2   :  { %v63_v23 = vadd.f32 %v62_v22, %v61_v21 }
 0x1e4   :  { %v64_v24 = vrot.slane %v63_v23, 2 }
 0x1e6   :  { %v65_v25 = vadd.f32 %v64_v24, %v63_v23 }
 0x1e8   :  { %v66_v26 = vrot.slane %v65_v25, 1 }
 0x1ea   :  { %v67_v27 = vadd.f32 %v66_v26, %v65_v25 }
 0x1ec   :  { %87 = vpush %v67_v27 }
 0x21d   :  { %s88_s23 = spop %87 }
 0x21e   :  { %v69_v28 = vstv %s88_s23 }
 0x21f   :  { %71 = vst [vmem:[#allocation7] sm:$0xff] %v69_v28 }
 0x220   :  { %131 = shalt.err (!%p128_p12)
}
 0x221   :  { %s132_s27 = scalar_lea.hbm %s192_s2, 128 }
 0x222   :  { %p133_p13 = scmp.ne.s32.totalorder %s192_s2, %s132_s27  ;;  %p136_p0 = scmp.lt.u32.totalorder %s132_s27, %s192_s2 }
 0x224   :  { %p138_p1 = pnand %p136_p0, %p133_p13 }
 0x226   :  { %141 = shalt.err (!%p138_p1)
}
 0x227   :  { %81 = dma.vmem_to_hbm [thread:$0]  %s79_s0, 128, %s192_s2, [#allocation6]  }
 0x228   :  { %144 = dma.done.wait [#allocation6], 128  }
 0x229   :  { %145 = vsyncadd [#allocation6], 4294967168 }
 0x22a   :  { %85 = vsyncpa [#allocation5], 1 }
 0x22b   :  { %86 = vsyncpa [#allocation6], 1 }

</bundles_post_ra>
